<compile_context>
chip_gen: v7x
topology: tpu7x:2x2x1
jax: 0.10.0
libtpu: 0.0.40
codegen_flags: <defaults>
</compile_context>

<pallas_src>
import jax
import jax.numpy as jnp
from jax.experimental import pallas as pl
from jax.experimental.pallas import tpu as pltpu

LN_EPS = 1e-5  # torch.nn.LayerNorm default


def _fusion_kernel(scalars_ref, x_ref, gw_ref, o_ref):
    # scalars_ref: SMEM (2,) f32  -- [c0, c1] folded scalar parameters
    # x_ref      : VMEM (tb, D)   -- cls tokens, natural row-major layout
    # gw_ref     : VMEM (1, D)    -- gamma * w row (grid-resident)
    # o_ref      : VMEM (tb, 1)   -- sigmoid(balance logit)
    x = x_ref[...].astype(jnp.float32)            # one load; reused below
    gw = gw_ref[...].astype(jnp.float32)          # [1, D] broadcast over rows
    inv_d = 1.0 / x.shape[1]

    # Single pass over the tile: all three reductions read the same vregs.
    sum_x = jnp.sum(x, axis=1, keepdims=True)             # [tb, 1]
    sum_x2 = jnp.sum(x * x, axis=1, keepdims=True)        # [tb, 1]
    sum_xgw = jnp.sum(x * gw, axis=1, keepdims=True)      # [tb, 1]

    mean = sum_x * inv_d
    var = jnp.maximum(sum_x2 * inv_d - mean * mean, 0.0)  # biased var (torch LN)
    rstd = jax.lax.rsqrt(var + LN_EPS)                    # EUP slot

    # Folded LayerNorm affine + Linear(D -> 1):
    #   logit = rstd * (sum_d(x_d * gamma_d * w_d) - mean * c0) + c1
    logits = rstd * (sum_xgw - mean * scalars_ref[0]) + scalars_ref[1]
    o_ref[...] = jax.nn.sigmoid(logits).astype(o_ref.dtype)


def _folded_jax(x2d, gw, c0, c1):
    """Same folded formula in plain JAX (small-shape bypass / ragged tail)."""
    xf = x2d.astype(jnp.float32)
    mean = jnp.mean(xf, axis=-1, keepdims=True)
    var = jnp.maximum(jnp.mean(xf * xf, axis=-1, keepdims=True) - mean * mean, 0.0)
    rstd = jax.lax.rsqrt(var + LN_EPS)
    s_xgw = jnp.sum(xf * gw[None, :], axis=-1, keepdims=True)
    logits = rstd * (s_xgw - mean * c0) + c1
    return jax.nn.sigmoid(logits)                          # [rows, 1] f32


def prompt_context_fusion(cls_token, gamma, beta, w, b, *,
                          block_b=8192, min_pallas_elems=1 << 16):
    """
    cls_token: [B, 1, D]
    gamma, beta: [D]   (LayerNorm affine params)
    w: [1, D], b: [1]  (Linear(D, 1), PyTorch convention y = x @ w.T + b)
    Returns: [B, 1, 1]
    """
    B, S, D = cls_token.shape
    assert S == 1
    assert block_b % 8 == 0
    out_dtype = cls_token.dtype

    # ---- fold parameters once (tiny, wrapper-side) ----
    gamma_f = gamma.reshape(D).astype(jnp.float32)
    beta_f = beta.reshape(D).astype(jnp.float32)
    w_f = w.reshape(D).astype(jnp.float32)
    gw = gamma_f * w_f                                      # [D]
    c0 = jnp.sum(gw)
    c1 = jnp.sum(beta_f * w_f) + b.reshape(()).astype(jnp.float32)

    # Natural layout, free reshape; input dtype preserved (bf16 stays bf16 on DMA).
    x = cls_token.reshape(B, D)

    # ---- small-shape bypass: below this the kernel is pure launch/DMA overhead ----
    if B * D < min_pallas_elems:
        return _folded_jax(x, gw, c0, c1).astype(out_dtype).reshape(B, 1, 1)

    # ---- batch (sublane) tile, VMEM-budget aware ----
    d_pad = ((D + 127) // 128) * 128          # minor dim pads to 128 lanes in VMEM
    # Keep double-buffered (x + out) tiles comfortably under ~32 MiB scoped VMEM.
    max_tb = max(8, ((16 * 1024 * 1024) // ((d_pad + 128) * 4)) // 8 * 8)
    tb = B if B <= min(block_b, max_tb) else min(block_b, max_tb)
    b_main = (B // tb) * tb                   # rows handled by the Pallas grid
    grid = (b_main // tb,)

    scalars = jnp.stack([c0, c1])             # SMEM (2,)
    gw_row = gw.reshape(1, D)                 # VMEM, grid-resident

    x_itemsize = jnp.dtype(x.dtype).itemsize
    o_itemsize = jnp.dtype(out_dtype).itemsize
    cost = pl.CostEstimate(
        flops=8 * b_main * D,
        transcendentals=2 * b_main,
        bytes_accessed=b_main * D * x_itemsize + b_main * o_itemsize + D * 4 + 8,
    )

    out_main = pl.pallas_call(
        _fusion_kernel,
        out_shape=jax.ShapeDtypeStruct((b_main, 1), out_dtype),
        grid_spec=pltpu.PrefetchScalarGridSpec(
            num_scalar_prefetch=0,
            grid=grid,
            in_specs=[
                pl.BlockSpec(memory_space=pltpu.SMEM),        # [c0, c1]
                pl.BlockSpec((tb, D), lambda i: (i, 0)),      # x rows, pipelined
                pl.BlockSpec((1, D), lambda i: (0, 0)),       # gamma*w, resident
            ],
            out_specs=pl.BlockSpec((tb, 1), lambda i: (i, 0)),
        ),
        compiler_params=pltpu.CompilerParams(
            # On v7x, pltpu.CORE_PARALLEL here shards batch tiles across both TCs.
            dimension_semantics=("parallel",),
            vmem_limit_bytes=40 * 1024 * 1024,
        ),
        cost_estimate=cost,
    )(scalars, x, gw_row)

    if b_main < B:
        # Ragged tail (< one tile): folded formula in plain JAX — avoids a
        # full-array pad/copy and out-of-bounds block semantics.
        tail = _folded_jax(x[b_main:], gw, c0, c1).astype(out_dtype)
        out_full = jnp.concatenate([out_main, tail], axis=0)
    else:
        out_full = out_main
    return out_full.reshape(B, 1, 1)


def _reference(cls_token, gamma, beta, w, b):
    x = cls_token.astype(jnp.float32)
    mean = jnp.mean(x, axis=-1, keepdims=True)
    var = jnp.mean((x - mean) ** 2, axis=-1, keepdims=True)
    xn = (x - mean) / jnp.sqrt(var + LN_EPS)
    y = xn * gamma.astype(jnp.float32) + beta.astype(jnp.float32)
    logits = jnp.einsum("bsd,od->bso", y, w.astype(jnp.float32)) + b.astype(jnp.float32)
    return jax.nn.sigmoid(logits)


if __name__ == "__main__":
    key = jax.random.PRNGKey(0)
    k_x1, k_w, k_b, k_g, k_be, k_x2, k_x3, k_x4 = jax.random.split(key, 8)

    D = 32
    w = jax.random.normal(k_w, (1, D), dtype=jnp.float32) * (1.0 / jnp.sqrt(D))
    b = jax.random.normal(k_b, (1,), dtype=jnp.float32) * 0.1
    gamma0 = jnp.ones((D,), dtype=jnp.float32)          # LayerNorm.weight init
    beta0 = jnp.zeros((D,), dtype=jnp.float32)          # LayerNorm.bias init
    gamma1 = 1.0 + 0.1 * jax.random.normal(k_g, (D,), dtype=jnp.float32)
    beta1 = 0.1 * jax.random.normal(k_be, (D,), dtype=jnp.float32)

    def check(out, ref, atol):
        assert out.shape == ref.shape, (out.shape, ref.shape)
        of = out.astype(jnp.float32)
        assert bool(jnp.all(jnp.isfinite(of)))
        assert jnp.allclose(of, ref, atol=atol, rtol=1e-4), float(
            jnp.max(jnp.abs(of - ref)))

    # 1) module-native tiny shape: batch=2, latent_dim=32 (small-shape bypass)
    B = 2
    x1 = jax.random.normal(k_x1, (B, 1, D), dtype=jnp.float32)
    out1 = jax.block_until_ready(prompt_context_fusion(x1, gamma0, beta0, w, b))
    assert out1.shape == (B, 1, 1), out1.shape
    check(out1, _reference(x1, gamma0, beta0, w, b), atol=2e-5)

    # 2) Pallas path, batch divides the tile (grid of 4)
    B = 512
    x2 = jax.random.normal(k_x2, (B, 1, D), dtype=jnp.float32)
    out2 = jax.block_until_ready(prompt_context_fusion(
        x2, gamma1, beta1, w, b, block_b=128, min_pallas_elems=0))
    check(out2, _reference(x2, gamma1, beta1, w, b), atol=2e-5)

    # 3) Pallas path with a ragged batch tail (512 rows via Pallas + 188 via JAX)
    B = 700
    x3 = jax.random.normal(k_x3, (B, 1, D), dtype=jnp.float32)
    out3 = jax.block_until_ready(prompt_context_fusion(
        x3, gamma1, beta1, w, b, block_b=256, min_pallas_elems=0))
    check(out3, _reference(x3, gamma1, beta1, w, b), atol=2e-5)

    # 4) single full-extent block (tile == whole batch, not a multiple of 8)
    B = 300
    x4 = jax.random.normal(k_x4, (B, 1, D), dtype=jnp.float32)
    out4 = jax.block_until_ready(prompt_context_fusion(
        x4, gamma1, beta1, w, b, min_pallas_elems=0))
    check(out4, _reference(x4, gamma1, beta1, w, b), atol=2e-5)

    # 5) bf16 input is DMA'd as bf16; upcast to f32 happens in-kernel
    B = 512
    x5 = jax.random.normal(k_x2, (B, 1, D), dtype=jnp.float32).astype(jnp.bfloat16)
    out5 = jax.block_until_ready(prompt_context_fusion(
        x5, gamma1, beta1, w, b, block_b=128, min_pallas_elems=0))
    assert out5.dtype == jnp.bfloat16
    check(out5, _reference(x5, gamma1, beta1, w, b), atol=3e-2)

    print("KERNEL_OK")
</pallas_src>

<mosaic_0001>
module attributes {stable_mosaic.version = 11 : i64} {
  func.func @_fusion_kernel(%arg0: i32, %arg1: memref<2xf32, #tpu.memory_space<smem>>, %arg2: memref<128x32xf32, #tpu.memory_space<vmem>>, %arg3: memref<1x32xf32, #tpu.memory_space<vmem>>, %arg4: memref<128x1xf32, #tpu.memory_space<vmem>>) attributes {dimension_semantics = [#tpu.dimension_semantics<parallel>], iteration_bounds = array<i64: 4>, scalar_prefetch = 0 : i64, scratch_operands = 0 : i64, tpu.core_type = #tpu.core_type<tc>, window_params = [{transform_indices = @transform_0, window_bounds = array<i64: 2>}, {transform_indices = @transform_1, window_bounds = array<i64: 128, 32>}, {pipeline_mode = #tpu.pipeline_mode<synchronous>, transform_indices = @transform_2, window_bounds = array<i64: 1, 32>}, {transform_indices = @transform_3, window_bounds = array<i64: 128, 1>}]} {
    %c0 = arith.constant 0 : index
    %c0_0 = arith.constant 0 : index
    %0 = vector.load %arg2[%c0, %c0_0] : memref<128x32xf32, #tpu.memory_space<vmem>>, vector<128x32xf32>
    %c0_1 = arith.constant 0 : index
    %c0_2 = arith.constant 0 : index
    %1 = vector.load %arg3[%c0_1, %c0_2] : memref<1x32xf32, #tpu.memory_space<vmem>>, vector<1x32xf32>
    %cst = arith.constant dense<0.000000e+00> : vector<128xf32>
    %2 = vector.multi_reduction <add>, %0, %cst [1] : vector<128x32xf32> to vector<128xf32>
    %3 = vector.shape_cast %2 : vector<128xf32> to vector<128x1xf32>
    %4 = arith.mulf %0, %0 : vector<128x32xf32>
    %cst_3 = arith.constant dense<0.000000e+00> : vector<128xf32>
    %5 = vector.multi_reduction <add>, %4, %cst_3 [1] : vector<128x32xf32> to vector<128xf32>
    %6 = vector.shape_cast %5 : vector<128xf32> to vector<128x1xf32>
    %7 = vector.broadcast %1 : vector<1x32xf32> to vector<128x32xf32>
    %8 = arith.mulf %0, %7 : vector<128x32xf32>
    %cst_4 = arith.constant dense<0.000000e+00> : vector<128xf32>
    %9 = vector.multi_reduction <add>, %8, %cst_4 [1] : vector<128x32xf32> to vector<128xf32>
    %10 = vector.shape_cast %9 : vector<128xf32> to vector<128x1xf32>
    %cst_5 = arith.constant 3.125000e-02 : f32
    %11 = vector.broadcast %cst_5 : f32 to vector<128x1xf32>
    %12 = arith.mulf %3, %11 : vector<128x1xf32>
    %cst_6 = arith.constant 3.125000e-02 : f32
    %13 = vector.broadcast %cst_6 : f32 to vector<128x1xf32>
    %14 = arith.mulf %6, %13 : vector<128x1xf32>
    %15 = arith.mulf %12, %12 : vector<128x1xf32>
    %16 = arith.subf %14, %15 : vector<128x1xf32>
    %cst_7 = arith.constant 0.000000e+00 : f32
    %17 = vector.broadcast %cst_7 : f32 to vector<128x1xf32>
    %18 = arith.maximumf %16, %17 : vector<128x1xf32>
    %cst_8 = arith.constant 9.99999974E-6 : f32
    %19 = vector.broadcast %cst_8 : f32 to vector<128x1xf32>
    %20 = arith.addf %18, %19 : vector<128x1xf32>
    %21 = math.rsqrt %20 : vector<128x1xf32>
    %c0_9 = arith.constant 0 : index
    %22 = memref.load %arg1[%c0_9] : memref<2xf32, #tpu.memory_space<smem>>
    %23 = vector.broadcast %22 : f32 to vector<128x1xf32>
    %24 = arith.mulf %12, %23 : vector<128x1xf32>
    %25 = arith.subf %10, %24 : vector<128x1xf32>
    %26 = arith.mulf %21, %25 : vector<128x1xf32>
    %c1 = arith.constant 1 : index
    %27 = memref.load %arg1[%c1] : memref<2xf32, #tpu.memory_space<smem>>
    %28 = vector.broadcast %27 : f32 to vector<128x1xf32>
    %29 = arith.addf %26, %28 : vector<128x1xf32>
    %30 = arith.negf %29 : vector<128x1xf32>
    %31 = math.exp %30 : vector<128x1xf32>
    %cst_10 = arith.constant 1.000000e+00 : f32
    %32 = vector.broadcast %cst_10 : f32 to vector<128x1xf32>
    %33 = arith.addf %32, %31 : vector<128x1xf32>
    %34 = arith.divf %32, %33 : vector<128x1xf32>
    %c0_11 = arith.constant 0 : index
    %c0_12 = arith.constant 0 : index
    %35 = vector.load %arg4[%c0_11, %c0_12] : memref<128x1xf32, #tpu.memory_space<vmem>>, vector<128x1xf32>
    tpu.vector_store %arg4[%c0_11, %c0_12], %34 {strides = array<i32>} : memref<128x1xf32, #tpu.memory_space<vmem>>, vector<128x1xf32>,
    return
  }
  func.func @transform_0(%arg0: i32) -> i32 {
    %c0_i32 = arith.constant 0 : i32
    %c0_i32_0 = arith.constant 0 : i32
    return %c0_i32 : i32
  }
  func.func @transform_1(%arg0: i32) -> (i32, i32) {
    %c0_i32 = arith.constant 0 : i32
    %c0_i32_0 = arith.constant 0 : i32
    return %arg0, %c0_i32 : i32, i32
  }
  func.func @transform_2(%arg0: i32) -> (i32, i32) {
    %c0_i32 = arith.constant 0 : i32
    %c0_i32_0 = arith.constant 0 : i32
    %c0_i32_1 = arith.constant 0 : i32
    return %c0_i32, %c0_i32_0 : i32, i32
  }
  func.func @transform_3(%arg0: i32) -> (i32, i32) {
    %c0_i32 = arith.constant 0 : i32
    %c0_i32_0 = arith.constant 0 : i32
    return %arg0, %c0_i32 : i32, i32
  }
}

</mosaic_0001>

<bundles_post_ra>
// kernel: tpu_custom_call.1
= control target key start
LH: loop header
LB: loop body
LE: loop exit
PB: predicated region body
PF: predicated region fallthrough
CT: control target
= control target key end

     0   :  { %8 = vsyncpa [#allocation3], 0  ;;  %s943_s12 = smov 0   ;;  %s1336_s0 = inlined_call_operand.vmem [shape: f32[2], index: 0, kind: input, shape index: {}]   ;;  %s1337_s1 = inlined_call_operand.vmem [shape: f32[512,32], index: 1, kind: input, shape index: {}]   ;;  %s1338_s2 = inlined_call_operand.vmem [shape: f32[1,32], index: 2, kind: input, shape index: {}]   ;;  %s1339_s3 = inlined_call_operand.vmem [shape: f32[512,1], index: 3, kind: output, shape index: {}]  }
   0x1 LB: > { %s749_s13 = sadd.s32 4294967295, %s920_s12   ;;  %p751_p0 = scmp.ge.s32.totalorder %s920_s12, 1  ;;  %s920_s12 = sphi %s943_s12, %s14_s12  }
   0x2   : > { %p113_p1 = scmp.lt.s32.totalorder %s920_s12, 5  ;;  %s126_s16 = sshll.u32 %s1336_s0, 4  ;;  %s127_s16 = int_to_ptr.vmem [resolvable:$true] %s126_s16 }
   0x3   : > { %p958_p3 = scmp.eq.s32.totalorder %s749_s13, 0  ;;  %s895_s19 = scalar_lea.vmem %s127_s16, 16 }
   0x4   : > { %p954_p2 = pnand %p751_p0, %p113_p1  ;;  %p896_p6 = scmp.ne.s32.totalorder %s127_s16, %s895_s19 }
   0x5   : > { %p903_p10 = scmp.lt.s32.totalorder %s127_s16, %s127_s16  ;;  %p904_p11 = scmp.lt.s32.totalorder %s895_s19, %s895_s19 }
   0x6   : > { %p784_p4 = pneg %p954_p2 }
   0x7   : > { %p905_p12 = por %p904_p11, %p903_p10 }
   0x8   : > { %p785_p5 = pnand %p958_p3, %p784_p4 }
   0xa   : > { %p897_p7 = pneg %p785_p5 }
   0xc   : > { %p898_p8 = pnand %p897_p7, %p896_p6 }
   0xe   : > { %p899_p9 = pneg %p898_p8 }
  0x10   : > { %p906_p13 = pnand %p905_p12, %p899_p9 }
  0x12   : > { %909 = shalt.err (!%p906_p13)
}
  0x13   : > { %s922_s20 = smov [#allocation2]   ;;  %151 = sbr.rel (%p954_p2) target bundleno = 307 (0x133), region = 32 }
  0x14   : > { %787 = dma.vmem_to_smem (!%p785_p5), %s127_s16, 16, %s922_s20, [#allocation3]  }
  0x1a   : > { %915 = dma.done.wait (%p958_p3), [#allocation3], 16  }
  0x1b   : > { %917 = vsyncadd (%p958_p3), [#allocation3], 4294967280 }
  0x1c   : > { %157 = sfence }
  0x1d   : > { %s756_s21 = sshll.u32 %s749_s13, 4  ;;  %vm205_vm0 = vcmask 261120   ;;  %v1022_v16 = vld [vmem:[%s1338_s2] ss:$0 sm:$0xff]  ;;  %s1194_s28 = sld [smem:[#allocation2]]  ;;  %vm664_vm1 = vcmask 7168  }
  0x1e   : > { %p177_p0 = scmp.lt.s32.totalorder %s756_s21, 63  ;;  %s1204_s29 = sld [smem:[#allocation2 + $0x1]] }
  0x20   : > { %s1343_s21 = smov (!%p177_p0, %s756_s21), 63 }
  0x21   : > { %s757_s22 = sshll.u32 %s1343_s21, 3 }
  0x22   : > { %s980_s25 = scalar_lea.vmem %s1337_s1, %s757_s22  ;;  %s1296_s5 = scalar_lea.vmem %s1339_s3, %s757_s22 }
  0x23   : > { %v190_v0 = vld [vmem:[%s980_s25 + $0x10] sm:$0xff]  ;;  %v984_v1 = vld [vmem:[%s980_s25] sm:$0xff]  ;;  %v987_v2 = vld [vmem:[%s980_s25 + $0x18] sm:$0xff] }
  0x24   : > { %v212_v3 = vsel %vm205_vm0, %v190_v0, 0.0  ;;  %v206_v4 = vsel %vm205_vm0, %v984_v1, 0.0  ;;  %v993_v5 = vld [vmem:[%s980_s25 + $0x8] sm:$0xff]  ;;  %v215_v6 = vsel %vm205_vm0, %v987_v2, 0.0  ;;  %v1003_v9 = vld [vmem:[%s980_s25 + $0x20] sm:$0xff]  ;;  %v1010_v12 = vld [vmem:[%s980_s25 + $0x38] sm:$0xff]  ;;  %v326_v19 = vmul.f32 %v1022_v16, %v190_v0 }
  0x25   : > { %213 = vadd.xlane.f32.xlu1 %v212_v3  ;;  %207 = vadd.xlane.f32.xlu0 %v206_v4  ;;  %v209_v7 = vsel %vm205_vm0, %v993_v5, 0.0  ;;  %v1000_v8 = vld [vmem:[%s980_s25 + $0x28] sm:$0xff]  ;;  %v218_v11 = vsel %vm205_vm0, %v1003_v9, 0.0  ;;  %v1013_v13 = vld [vmem:[%s980_s25 + $0x30] sm:$0xff]  ;;  %v227_v14 = vsel %vm205_vm0, %v1010_v12, 0.0  ;;  %v1028_v18 = vld [vmem:[%s980_s25 + $0x40] sm:$0xff]  ;;  %v255_v35 = vmul.f32 %v993_v5, %v993_v5 }
  0x26   : > { %v221_v10 = vsel %vm205_vm0, %v1000_v8, 0.0  ;;  %v224_v15 = vsel %vm205_vm0, %v1013_v13, 0.0  ;;  %v1025_v17 = vld [vmem:[%s980_s25 + $0x48] sm:$0xff]  ;;  %v1032_v20 = vsel %vm205_vm0, %v326_v19, 0.0  ;;  %v230_v22 = vsel %vm205_vm0, %v1028_v18, 0.0  ;;  %v1039_v23 = vld [vmem:[%s980_s25 + $0x58] sm:$0xff] }
  0x27   : > { %v233_v21 = vsel %vm205_vm0, %v1025_v17, 0.0  ;;  %v1042_v24 = vld [vmem:[%s980_s25 + $0x50] sm:$0xff]  ;;  %v239_v25 = vsel %vm205_vm0, %v1039_v23, 0.0  ;;  %v1049_v27 = vld [vmem:[%s980_s25 + $0x68] sm:$0xff]  ;;  %v1052_v28 = vld [vmem:[%s980_s25 + $0x60] sm:$0xff]  ;;  %v254_v36 = vmul.f32 %v984_v1, %v984_v1  ;;  %v273_v37 = vsel %vm205_vm0, %v255_v35, 0.0 }
  0x28   : > { %v236_v26 = vsel %vm205_vm0, %v1042_v24, 0.0  ;;  %v245_v29 = vsel %vm205_vm0, %v1049_v27, 0.0  ;;  %v242_v30 = vsel %vm205_vm0, %v1052_v28, 0.0  ;;  %v1059_v31 = vld [vmem:[%s980_s25 + $0x78] sm:$0xff]  ;;  %v1062_v32 = vld [vmem:[%s980_s25 + $0x70] sm:$0xff]  ;;  %v257_v39 = vmul.f32 %v987_v2, %v987_v2 }
  0x29   : > { %216 = vadd.xlane.f32.xlu1 %v215_v6  ;;  %210 = vadd.xlane.f32.xlu0 %v209_v7  ;;  %v251_v33 = vsel %vm205_vm0, %v1059_v31, 0.0  ;;  %v248_v34 = vsel %vm205_vm0, %v1062_v32, 0.0  ;;  %v270_v38 = vsel %vm205_vm0, %v254_v36, 0.0  ;;  %v256_v40 = vmul.f32 %v190_v0, %v190_v0 }
  0x2a   : > { %v279_v41 = vsel %vm205_vm0, %v257_v39, 0.0  ;;  %v259_v43 = vmul.f32 %v1000_v8, %v1000_v8  ;;  %v258_v44 = vmul.f32 %v1003_v9, %v1003_v9  ;;  %v261_v47 = vmul.f32 %v1010_v12, %v1010_v12 }
  0x2b   : > { %v276_v42 = vsel %vm205_vm0, %v256_v40, 0.0  ;;  %v260_v48 = vmul.f32 %v1013_v13, %v1013_v13  ;;  %v263_v51 = vmul.f32 %v1025_v17, %v1025_v17  ;;  %v262_v52 = vmul.f32 %v1028_v18, %v1028_v18 }
  0x2c   : > { %v285_v45 = vsel %vm205_vm0, %v259_v43, 0.0  ;;  %v282_v46 = vsel %vm205_vm0, %v258_v44, 0.0  ;;  %v291_v49 = vsel %vm205_vm0, %v261_v47, 0.0  ;;  %v265_v55 = vmul.f32 %v1039_v23, %v1039_v23 }
  0x2d   : > { %222 = vadd.xlane.f32.xlu1 %v221_v10  ;;  %219 = vadd.xlane.f32.xlu0 %v218_v11  ;;  %v288_v50 = vsel %vm205_vm0, %v260_v48, 0.0  ;;  %v297_v53 = vsel %vm205_vm0, %v263_v51, 0.0  ;;  %v294_v54 = vsel %vm205_vm0, %v262_v52, 0.0  ;;  %v264_v56 = vmul.f32 %v1042_v24, %v1042_v24 }
  0x2e   : > { %v303_v57 = vsel %vm205_vm0, %v265_v55, 0.0  ;;  %v267_v59 = vmul.f32 %v1049_v27, %v1049_v27  ;;  %v266_v60 = vmul.f32 %v1052_v28, %v1052_v28  ;;  %v269_v63 = vmul.f32 %v1059_v31, %v1059_v31 }
  0x2f   : > { %v300_v58 = vsel %vm205_vm0, %v264_v56, 0.0  ;;  %v268_v0 = vmul.f32 %v1062_v32, %v1062_v32  ;;  %v325_v6 = vmul.f32 %v1022_v16, %v993_v5  ;;  %v324_v7 = vmul.f32 %v1022_v16, %v984_v1 }
  0x30   : > { %v309_v61 = vsel %vm205_vm0, %v267_v59, 0.0  ;;  %v306_v62 = vsel %vm205_vm0, %v266_v60, 0.0  ;;  %v315_v3 = vsel %vm205_vm0, %v269_v63, 0.0  ;;  %v329_v19 = vmul.f32 %v1022_v16, %v1000_v8 }
  0x31   : > { %228 = vadd.xlane.f32.xlu1 %v227_v14  ;;  %225 = vadd.xlane.f32.xlu0 %v224_v15  ;;  %v312_v4 = vsel %vm205_vm0, %v268_v0, 0.0  ;;  %v343_v10 = vsel %vm205_vm0, %v325_v6, 0.0  ;;  %v340_v11 = vsel %vm205_vm0, %v324_v7, 0.0  ;;  %v327_v14 = vmul.f32 %v1022_v16, %v987_v2 }
  0x32   : > { %v328_v5 = vmul.f32 %v1022_v16, %v1003_v9  ;;  %v355_v1 = vsel %vm205_vm0, %v329_v19, 0.0  ;;  %v331_v2 = vmul.f32 %v1022_v16, %v1010_v12  ;;  %v333_v9 = vmul.f32 %v1022_v16, %v1025_v17 }
  0x33   : > { %v349_v15 = vsel %vm205_vm0, %v327_v14, 0.0  ;;  %v338_v35 = vmul.f32 %v1022_v16, %v1062_v32 }
  0x34   : > { %v361_v8 = vsel %vm205_vm0, %v331_v2, 0.0 }
  0x35   : > { %234 = vadd.xlane.f32.xlu1 %v233_v21  ;;  %231 = vadd.xlane.f32.xlu0 %v230_v22  ;;  %v352_v21 = vsel %vm205_vm0, %v328_v5, 0.0  ;;  %v330_v22 = vmul.f32 %v1022_v16, %v1013_v13  ;;  %v335_v13 = vmul.f32 %v1022_v16, %v1039_v23 }
  0x39   : > { %240 = vadd.xlane.f32.xlu1 %v239_v25  ;;  %237 = vadd.xlane.f32.xlu0 %v236_v26  ;;  %v358_v25 = vsel %vm205_vm0, %v330_v22, 0.0  ;;  %v367_v26 = vsel %vm205_vm0, %v333_v9, 0.0 }
  0x3d   : > { %246 = vadd.xlane.f32.xlu1 %v245_v29  ;;  %243 = vadd.xlane.f32.xlu0 %v242_v30  ;;  %v334_v29 = vmul.f32 %v1022_v16, %v1042_v24  ;;  %v373_v30 = vsel %vm205_vm0, %v335_v13, 0.0  ;;  %v339_v24 = vmul.f32 %v1022_v16, %v1059_v31 }
  0x3f   : > { %v370_v17 = vsel %vm205_vm0, %v334_v29, 0.0  ;;  %v385_v36 = vsel %vm205_vm0, %v339_v24, 0.0 }
  0x41   : > { %252 = vadd.xlane.f32.xlu1 %v251_v33  ;;  %249 = vadd.xlane.f32.xlu0 %v248_v34  ;;  %v336_v33 = vmul.f32 %v1022_v16, %v1052_v28 }
  0x43   : > { %v376_v23 = vsel %vm205_vm0, %v336_v33, 0.0 }
  0x45   : > { %274 = vadd.xlane.f32.xlu1 %v273_v37  ;;  %271 = vadd.xlane.f32.xlu0 %v270_v38 }
  0x49   : > { %280 = vadd.xlane.f32.xlu1 %v279_v41  ;;  %277 = vadd.xlane.f32.xlu0 %v276_v42 }
  0x4d   : > { %286 = vadd.xlane.f32.xlu1 %v285_v45  ;;  %283 = vadd.xlane.f32.xlu0 %v282_v46 }
  0x51   : > { %292 = vadd.xlane.f32.xlu1 %v291_v49  ;;  %289 = vadd.xlane.f32.xlu0 %v288_v50 }
  0x55   : > { %298 = vadd.xlane.f32.xlu1 %v297_v53  ;;  %295 = vadd.xlane.f32.xlu0 %v294_v54 }
  0x59   : > { %304 = vadd.xlane.f32.xlu1 %v303_v57  ;;  %301 = vadd.xlane.f32.xlu0 %v300_v58 }
  0x5d   : > { %310 = vadd.xlane.f32.xlu1 %v309_v61  ;;  %307 = vadd.xlane.f32.xlu0 %v306_v62 }
  0x61   : > { %316 = vadd.xlane.f32.xlu1 %v315_v3  ;;  %313 = vadd.xlane.f32.xlu0 %v312_v4 }
  0x65   : > { %344 = vadd.xlane.f32.xlu1 %v343_v10  ;;  %341 = vadd.xlane.f32.xlu0 %v340_v11 }
  0x69   : > { %350 = vadd.xlane.f32.xlu1 %v349_v15  ;;  %347 = vadd.xlane.f32.xlu0 %v1032_v20  ;;  %v332_v20 = vmul.f32 %v1022_v16, %v1028_v18  ;;  %v337_v18 = vmul.f32 %v1022_v16, %v1049_v27  ;;  %v382_v27 = vsel %vm205_vm0, %v338_v35, 0.0 }
  0x6b   : > { %v364_v12 = vsel %vm205_vm0, %v332_v20, 0.0  ;;  %v379_v34 = vsel %vm205_vm0, %v337_v18, 0.0 }
  0x6d   : > { %356 = vadd.xlane.f32.xlu1 %v355_v1  ;;  %353 = vadd.xlane.f32.xlu0 %v352_v21 }
  0x71   : > { %362 = vadd.xlane.f32.xlu1 %v361_v8  ;;  %359 = vadd.xlane.f32.xlu0 %v358_v25 }
  0x75   : > { %368 = vadd.xlane.f32.xlu1 %v367_v26  ;;  %365 = vadd.xlane.f32.xlu0 %v364_v12 }
  0x79   : > { %374 = vadd.xlane.f32.xlu1 %v373_v30  ;;  %371 = vadd.xlane.f32.xlu0 %v370_v17 }
  0x7d   : > { %380 = vadd.xlane.f32.xlu1 %v379_v34  ;;  %377 = vadd.xlane.f32.xlu0 %v376_v23 }
  0x81   : > { %386 = vadd.xlane.f32.xlu1 %v385_v36  ;;  %383 = vadd.xlane.f32.xlu0 %v382_v27 }
  0xb2   : > { %v214_v28 = vpop.xlane.xlu1 %213  ;;  %v208_v37 = vpop.xlane.xlu0 %207 }
  0xb3   : > { %v1170_v54 = vmul.f32 0.03125, %v208_v37  ;;  %v1174_v60 = vmul.f32 0.03125, %v214_v28 }
  0xb5   : > { %v420_v62 = vmul.f32 %v1170_v54, %v1170_v54  ;;  %v422_v19 = vmul.f32 %v1174_v60, %v1174_v60 }
  0xb6   : > { %v217_v38 = vpop.xlane.xlu1 %216  ;;  %v211_v39 = vpop.xlane.xlu0 %210 }
  0xb7   : > { %v1168_v53 = vmul.f32 0.03125, %v211_v39  ;;  %v1172_v58 = vmul.f32 0.03125, %v217_v38 }
  0xb9   : > { %v421_v61 = vmul.f32 %v1168_v53, %v1168_v53  ;;  %v423_v11 = vmul.f32 %v1172_v58, %v1172_v58 }
  0xba   : > { %v223_v40 = vpop.xlane.xlu1 %222  ;;  %v220_v41 = vpop.xlane.xlu0 %219 }
  0xbb   : > { %v1180_v63 = vmul.f32 0.03125, %v223_v40  ;;  %v1182_v3 = vmul.f32 0.03125, %v220_v41 }
  0xbd   : > { %v425_v2 = vmul.f32 %v1180_v63, %v1180_v63  ;;  %v424_v25 = vmul.f32 %v1182_v3, %v1182_v3 }
  0xbe   : > { %v229_v42 = vpop.xlane.xlu1 %228  ;;  %v226_v43 = vpop.xlane.xlu0 %225 }
  0xbf   : > { %v1186_v14 = vmul.f32 0.03125, %v229_v42  ;;  %v1190_v5 = vmul.f32 0.03125, %v226_v43 }
  0xc1   : > { %v427_v29 = vmul.f32 %v1186_v14, %v1186_v14  ;;  %v426_v33 = vmul.f32 %v1190_v5, %v1190_v5 }
  0xc2   : > { %v235_v31 = vpop.xlane.xlu1 %234  ;;  %v232_v44 = vpop.xlane.xlu0 %231 }
  0xc3   : > { %v1192_v1 = vmul.f32 0.03125, %v235_v31  ;;  %v1202_v30 = vmul.f32 0.03125, %v232_v44 }
  0xc5   : > { %v429_v34 = vmul.f32 %v1192_v1, %v1192_v1  ;;  %v428_v43 = vmul.f32 %v1202_v30, %v1202_v30 }
  0xc6   : > { %v241_v45 = vpop.xlane.xlu1 %240  ;;  %v238_v16 = vpop.xlane.xlu0 %237 }
  0xc7   : > { %v1210_v35 = vmul.f32 0.03125, %v241_v45  ;;  %v1212_v37 = vmul.f32 0.03125, %v238_v16 }
  0xc9   : > { %v431_v16 = vmul.f32 %v1210_v35, %v1210_v35 }
  0xca   : > { %v1160_v32 = vpop.xlane.xlu1 %246  ;;  %v1162_v46 = vpop.xlane.xlu0 %243 }
  0xce   : > { %v1164_v47 = vpop.xlane.xlu1 %252  ;;  %v1166_v48 = vpop.xlane.xlu0 %249 }
  0xd2   : > { %v275_v49 = vpop.xlane.xlu1 %274  ;;  %v272_v50 = vpop.xlane.xlu0 %271 }
  0xd3   : > { %v405_v55 = vmul.f32 0.03125, %v275_v49  ;;  %v404_v59 = vmul.f32 0.03125, %v272_v50 }
  0xd5   : > { %v437_v4 = vsub.f32 %v405_v55, %v421_v61  ;;  %v436_v15 = vsub.f32 %v404_v59, %v420_v62  ;;  %v430_v59 = vmul.f32 %v1212_v37, %v1212_v37 }
  0xd6   : > { %v281_v51 = vpop.xlane.xlu1 %280  ;;  %v278_v52 = vpop.xlane.xlu0 %277 }
  0xd7   : > { %v407_v0 = vmul.f32 0.03125, %v281_v51  ;;  %v406_v6 = vmul.f32 0.03125, %v278_v52  ;;  %v453_v9 = vmax.f32 %v437_v4, 0.0  ;;  %v452_v17 = vmax.f32 %v436_v15, 0.0 }
  0xd8   : > { %v1217_v52 = vstv %s1194_s28 }
  0xd9   : > { %v439_v22 = vsub.f32 %v407_v0, %v423_v11  ;;  %v438_v20 = vsub.f32 %v406_v6, %v422_v19  ;;  %v469_v38 = vadd.f32 1e-05, %v453_v9  ;;  %v468_v31 = vadd.f32 1e-05, %v452_v17 }
  0xda   : > { %v287_v56 = vpop.xlane.xlu1 %286  ;;  %v284_v57 = vpop.xlane.xlu0 %283  ;;  %v1227_v11 = vmul.f32 0.03125, %v1160_v32  ;;  %v1234_v32 = vmul.f32 0.03125, %v1162_v46  ;;  %v503_v17 = vmul.f32 %v1217_v52, %v1168_v53  ;;  %v505_v46 = vmul.f32 %v1217_v52, %v1172_v58 }
  0xdb   : > { %v409_v21 = vmul.f32 0.03125, %v287_v56  ;;  %v408_v8 = vmul.f32 0.03125, %v284_v57  ;;  %v455_v36 = vmax.f32 %v439_v22, 0.0  ;;  %v454_v39 = vmax.f32 %v438_v20, 0.0 }
  0xdc   : > { %799 = vrsqrt.f32 %v469_v38  ;;  %v507_v53 = vmul.f32 %v1217_v52, %v1180_v63 }
  0xdd   : > { %v441_v23 = vsub.f32 %v409_v21, %v425_v2  ;;  %v440_v27 = vsub.f32 %v408_v8, %v424_v25  ;;  %v471_v55 = vadd.f32 1e-05, %v455_v36  ;;  %v470_v61 = vadd.f32 1e-05, %v454_v39 }
  0xde   : > { %v293_v7 = vpop.xlane.xlu1 %292  ;;  %v290_v10 = vpop.xlane.xlu0 %289  ;;  %801 = vrsqrt.f32 %v468_v31  ;;  %v502_v8 = vmul.f32 %v1217_v52, %v1170_v54 }
  0xdf   : > { %v411_v26 = vmul.f32 0.03125, %v293_v7  ;;  %v410_v18 = vmul.f32 0.03125, %v290_v10  ;;  %v457_v50 = vmax.f32 %v441_v23, 0.0  ;;  %v456_v56 = vmax.f32 %v440_v27, 0.0 }
  0xe0   : > { %v1224_v10 = vstv %s1204_s29  ;;  %803 = vrsqrt.f32 %v471_v55 }
  0xe1   : > { %v443_v40 = vsub.f32 %v411_v26, %v427_v29  ;;  %v442_v44 = vsub.f32 %v410_v18, %v426_v33  ;;  %v473_v15 = vadd.f32 1e-05, %v457_v50  ;;  %v472_v2 = vadd.f32 1e-05, %v456_v56 }
  0xe2   : > { %v299_v12 = vpop.xlane.xlu1 %298  ;;  %v296_v13 = vpop.xlane.xlu0 %295  ;;  %805 = vrsqrt.f32 %v470_v61  ;;  %v433_v18 = vmul.f32 %v1227_v11, %v1227_v11 }
  0xe3   : > { %v413_v24 = vmul.f32 0.03125, %v299_v12  ;;  %v412_v28 = vmul.f32 0.03125, %v296_v13  ;;  %v459_v62 = vmax.f32 %v443_v40, 0.0  ;;  %v458_v6 = vmax.f32 %v442_v44, 0.0 }
  0xe4   : > { %v504_v12 = vmul.f32 %v1217_v52, %v1174_v60  ;;  %807 = vrsqrt.f32 %v473_v15  ;;  %v1250_v40 = vmul.f32 0.03125, %v1166_v48 }
  0xe5   : > { %v445_v45 = vsub.f32 %v413_v24, %v429_v34  ;;  %v444_v57 = vsub.f32 %v412_v28, %v428_v43  ;;  %v475_v25 = vadd.f32 1e-05, %v459_v62  ;;  %v474_v13 = vadd.f32 1e-05, %v458_v6 }
  0xe6   : > { %v305_v41 = vpop.xlane.xlu1 %304  ;;  %v302_v42 = vpop.xlane.xlu0 %301  ;;  %v1241_v34 = vmul.f32 0.03125, %v1164_v47  ;;  %809 = vrsqrt.f32 %v472_v2  ;;  %v432_v28 = vmul.f32 %v1234_v32, %v1234_v32  ;;  %v434_v61 = vmul.f32 %v1250_v40, %v1250_v40 }
  0xe7   : > { %v415_v49 = vmul.f32 0.03125, %v305_v41  ;;  %v414_v51 = vmul.f32 0.03125, %v302_v42  ;;  %v461_v19 = vmax.f32 %v445_v45, 0.0  ;;  %v460_v22 = vmax.f32 %v444_v57, 0.0  ;;  %v800_v39 = vpop.eup %799 }
  0xe8   : > { %811 = vrsqrt.f32 %v475_v25  ;;  %v802_v42 = vpop.eup %801  ;;  %v435_v43 = vmul.f32 %v1241_v34, %v1241_v34 }
  0xe9   : > { %v447_v7 = vsub.f32 %v415_v49, %v431_v16  ;;  %v446_v21 = vsub.f32 %v414_v51, %v430_v59  ;;  %v477_v54 = vadd.f32 1e-05, %v461_v19  ;;  %v476_v23 = vadd.f32 1e-05, %v460_v22 }
  0xea   : > { %v311_v0 = vpop.xlane.xlu1 %310  ;;  %v308_v4 = vpop.xlane.xlu0 %307  ;;  %813 = vrsqrt.f32 %v474_v13 }
  0xeb   : > { %v417_v9 = vmul.f32 0.03125, %v311_v0  ;;  %v463_v29 = vmax.f32 %v447_v7, 0.0  ;;  %v462_v33 = vmax.f32 %v446_v21, 0.0  ;;  %v416_v24 = vmul.f32 0.03125, %v308_v4  ;;  %v804_v55 = vpop.eup %803 }
  0xec   : > { %815 = vrsqrt.f32 %v477_v54  ;;  %v806_v59 = vpop.eup %805  ;;  %v506_v0 = vmul.f32 %v1217_v52, %v1182_v3 }
  0xed   : > { %v449_v60 = vsub.f32 %v417_v9, %v433_v18  ;;  %v479_v38 = vadd.f32 1e-05, %v463_v29  ;;  %v478_v58 = vadd.f32 1e-05, %v462_v33  ;;  %817 = vrsqrt.f32 %v476_v23 }
  0xee   : > { %v317_v20 = vpop.xlane.xlu1 %316  ;;  %v314_v26 = vpop.xlane.xlu0 %313  ;;  %v448_v49 = vsub.f32 %v416_v24, %v432_v28  ;;  %v508_v18 = vmul.f32 %v1217_v52, %v1190_v5 }
  0xef   : > { %v419_v31 = vmul.f32 0.03125, %v317_v20  ;;  %v465_v44 = vmax.f32 %v449_v60, 0.0  ;;  %v418_v50 = vmul.f32 0.03125, %v314_v26  ;;  %819 = vrsqrt.f32 %v479_v38  ;;  %v808_v19 = vpop.eup %807 }
  0xf0   : > { %821 = vrsqrt.f32 %v478_v58  ;;  %v464_v2 = vmax.f32 %v448_v49, 0.0  ;;  %v810_v20 = vpop.eup %809 }
  0xf1   : > { %v451_v4 = vsub.f32 %v419_v31, %v435_v43  ;;  %v481_v21 = vadd.f32 1e-05, %v465_v44  ;;  %v450_v22 = vsub.f32 %v418_v50, %v434_v61 }
  0xf2   : > { %v345_v36 = vpop.xlane.xlu1 %344  ;;  %v342_v27 = vpop.xlane.xlu0 %341 }
  0xf3   : > { %v519_v47 = vsub.f32 %v345_v36, %v503_v17  ;;  %v518_v41 = vsub.f32 %v342_v27, %v502_v8  ;;  %v812_v29 = vpop.eup %811  ;;  %v509_v17 = vmul.f32 %v1217_v52, %v1186_v14  ;;  %v467_v33 = vmax.f32 %v451_v4, 0.0 }
  0xf4   : > { %v814_v54 = vpop.eup %813  ;;  %v480_v36 = vadd.f32 1e-05, %v464_v2  ;;  %v466_v27 = vmax.f32 %v450_v22, 0.0  ;;  %v512_v4 = vmul.f32 %v1217_v52, %v1212_v37  ;;  %v515_v37 = vmul.f32 %v1217_v52, %v1227_v11 }
  0xf5   : > { %v535_v63 = vmul.f32 %v800_v39, %v519_v47  ;;  %v534_v45 = vmul.f32 %v802_v42, %v518_v41  ;;  %v511_v41 = vmul.f32 %v1217_v52, %v1192_v1  ;;  %v483_v43 = vadd.f32 1e-05, %v467_v33 }
  0xf6   : > { %v351_v51 = vpop.xlane.xlu1 %350  ;;  %v348_v16 = vpop.xlane.xlu0 %347  ;;  %v482_v50 = vadd.f32 1e-05, %v466_v27 }
  0xf7   : > { %v553_v48 = vadd.f32 %v1224_v10, %v535_v63  ;;  %v521_v56 = vsub.f32 %v351_v51, %v505_v46  ;;  %v520_v57 = vsub.f32 %v348_v16, %v504_v12  ;;  %v552_v62 = vadd.f32 %v1224_v10, %v534_v45  ;;  %v816_v24 = vpop.eup %815 }
  0xf8   : > { %v818_v47 = vpop.eup %817  ;;  %v510_v16 = vmul.f32 %v1217_v52, %v1202_v30 }
  0xf9   : > { %v763_v6 = vmul.f32 -1.442695, %v553_v48  ;;  %v537_v7 = vmul.f32 %v804_v55, %v521_v56  ;;  %v536_v15 = vmul.f32 %v806_v59, %v520_v57  ;;  %v762_v8 = vmul.f32 -1.442695, %v552_v62  ;;  %v820_v42 = vpop.eup %819 }
  0xfa   : > { %v357_v25 = vpop.xlane.xlu1 %356  ;;  %v354_v9 = vpop.xlane.xlu0 %353  ;;  %v513_v59 = vmul.f32 %v1217_v52, %v1210_v35 }
  0xfb   : > { %823 = vpow2.f32 %v763_v6  ;;  %v555_v26 = vadd.f32 %v1224_v10, %v537_v7  ;;  %v554_v12 = vadd.f32 %v1224_v10, %v536_v15  ;;  %v523_v13 = vsub.f32 %v357_v25, %v507_v53  ;;  %v822_v49 = vpop.eup %821 }
  0xfc   : > { %825 = vpow2.f32 %v762_v8  ;;  %v522_v3 = vsub.f32 %v354_v9, %v506_v0 }
  0xfd   : > { %v765_v23 = vmul.f32 -1.442695, %v555_v26  ;;  %v764_v46 = vmul.f32 -1.442695, %v554_v12  ;;  %v539_v60 = vmul.f32 %v808_v19, %v523_v13  ;;  %827 = vrsqrt.f32 %v481_v21 }
  0xfe   : > { %v538_v28 = vmul.f32 %v810_v20, %v522_v3  ;;  %v363_v53 = vpop.xlane.xlu1 %362  ;;  %v360_v38 = vpop.xlane.xlu0 %359  ;;  %v514_v13 = vmul.f32 %v1217_v52, %v1234_v32  ;;  %v517_v32 = vmul.f32 %v1217_v52, %v1241_v34 }
  0xff   : > { %829 = vpow2.f32 %v765_v23  ;;  %v557_v39 = vadd.f32 %v1224_v10, %v539_v60  ;;  %v525_v14 = vsub.f32 %v363_v53, %v509_v17  ;;  %v524_v58 = vsub.f32 %v360_v38, %v508_v18 }
 0x100   : > { %831 = vpow2.f32 %v764_v46  ;;  %v556_v5 = vadd.f32 %v1224_v10, %v538_v28  ;;  %v516_v38 = vmul.f32 %v1217_v52, %v1250_v40 }
 0x101   : > { %v767_v31 = vmul.f32 -1.442695, %v557_v39  ;;  %v541_v63 = vmul.f32 %v812_v29, %v525_v14  ;;  %v540_v44 = vmul.f32 %v814_v54, %v524_v58  ;;  %833 = vrsqrt.f32 %v480_v36 }
 0x102   : > { %v766_v45 = vmul.f32 -1.442695, %v556_v5  ;;  %v369_v51 = vpop.xlane.xlu1 %368  ;;  %v366_v55 = vpop.xlane.xlu0 %365 }
 0x103   : > { %835 = vpow2.f32 %v767_v31  ;;  %v559_v48 = vadd.f32 %v1224_v10, %v541_v63  ;;  %v558_v56 = vadd.f32 %v1224_v10, %v540_v44  ;;  %v527_v1 = vsub.f32 %v369_v51, %v511_v41 }
 0x104   : > { %837 = vpow2.f32 %v766_v45  ;;  %v526_v57 = vsub.f32 %v366_v55, %v510_v16 }
 0x105   : > { %v824_v61 = vpop.eup %823  ;;  %839 = vrsqrt.f32 %v483_v43  ;;  %v769_v62 = vmul.f32 -1.442695, %v559_v48  ;;  %v543_v0 = vmul.f32 %v816_v24, %v527_v1  ;;  %v768_v7 = vmul.f32 -1.442695, %v558_v56 }
 0x106   : > { %v826_v30 = vpop.eup %825  ;;  %841 = vrsqrt.f32 %v482_v50  ;;  %v617_v6 = vadd.f32 1.0, %v824_v61  ;;  %v542_v15 = vmul.f32 %v818_v47, %v526_v57  ;;  %v375_v19 = vpop.xlane.xlu1 %374 }
 0x107   : > { %v372_v21 = vpop.xlane.xlu0 %371  ;;  %v616_v2 = vadd.f32 1.0, %v826_v30  ;;  %843 = vpow2.f32 %v769_v62  ;;  %v561_v22 = vadd.f32 %v1224_v10, %v543_v0  ;;  %v529_v8 = vsub.f32 %v375_v19, %v513_v59  ;;  %v828_v35 = vpop.eup %827 }
 0x108   : > { %845 = vrcp.f32 %v617_v6  ;;  %v560_v25 = vadd.f32 %v1224_v10, %v542_v15  ;;  %v528_v9 = vsub.f32 %v372_v21, %v512_v4 }
 0x109   : > { %v830_v20 = vpop.eup %829  ;;  %847 = vrcp.f32 %v616_v2  ;;  %v771_v26 = vmul.f32 -1.442695, %v561_v22  ;;  %v545_v12 = vmul.f32 %v820_v42, %v529_v8 }
 0x10a   : > { %v832_v29 = vpop.eup %831  ;;  %v619_v3 = vadd.f32 1.0, %v830_v20  ;;  %849 = vpow2.f32 %v768_v7  ;;  %v770_v17 = vmul.f32 -1.442695, %v560_v25  ;;  %v544_v18 = vmul.f32 %v822_v49, %v528_v9  ;;  %v381_v54 = vpop.xlane.xlu1 %380 }
 0x10b   : > { %v378_v33 = vpop.xlane.xlu0 %377  ;;  %v618_v23 = vadd.f32 1.0, %v832_v29  ;;  %851 = vpow2.f32 %v771_v26  ;;  %v563_v46 = vadd.f32 %v1224_v10, %v545_v12  ;;  %v531_v60 = vsub.f32 %v381_v54, %v515_v37  ;;  %v834_v11 = vpop.eup %833 }
 0x10c   : > { %853 = vrcp.f32 %v619_v3  ;;  %v562_v24 = vadd.f32 %v1224_v10, %v544_v18  ;;  %v530_v36 = vsub.f32 %v378_v33, %v514_v13 }
 0x10d   : > { %v836_v27 = vpop.eup %835  ;;  %855 = vrcp.f32 %v618_v23  ;;  %v773_v28 = vmul.f32 -1.442695, %v563_v46  ;;  %v547_v53 = vmul.f32 %v828_v35, %v531_v60 }
 0x10e   : > { %v838_v47 = vpop.eup %837  ;;  %v621_v39 = vadd.f32 1.0, %v836_v27  ;;  %857 = vpow2.f32 %v770_v17  ;;  %v772_v14 = vmul.f32 -1.442695, %v562_v24  ;;  %v546_v58 = vmul.f32 %v834_v11, %v530_v36  ;;  %v387_v5 = vpop.xlane.xlu1 %386 }
 0x10f   : > { %v384_v41 = vpop.xlane.xlu0 %383  ;;  %v840_v42 = vpop.eup %839  ;;  %v620_v43 = vadd.f32 1.0, %v838_v47  ;;  %859 = vpow2.f32 %v773_v28  ;;  %v565_v34 = vadd.f32 %v1224_v10, %v547_v53  ;;  %v533_v31 = vsub.f32 %v387_v5, %v517_v32 }
 0x110   : > { %v842_v63 = vpop.eup %841  ;;  %861 = vrcp.f32 %v621_v39  ;;  %v564_v52 = vadd.f32 %v1224_v10, %v546_v58  ;;  %v532_v40 = vsub.f32 %v384_v41, %v516_v38 }
 0x111   : > { %v844_v44 = vpop.eup %843  ;;  %863 = vrcp.f32 %v620_v43  ;;  %v775_v49 = vmul.f32 -1.442695, %v565_v34  ;;  %v549_v50 = vmul.f32 %v840_v42, %v533_v31 }
 0x112   : > { %v846_v45 = vpop.eup %845  ;;  %v623_v51 = vadd.f32 1.0, %v844_v44  ;;  %865 = vpow2.f32 %v772_v14  ;;  %v774_v16 = vmul.f32 -1.442695, %v564_v52  ;;  %v548_v55 = vmul.f32 %v842_v63, %v532_v40 }
 0x113   : > { %v848_v48 = vpop.eup %847  ;;  %666 = vst.msk [vmem:[%s1296_s5 + $0x8] sm:$0xff] %vm664_vm1, %v846_v45  ;;  %867 = vpow2.f32 %v775_v49  ;;  %v567_v56 = vadd.f32 %v1224_v10, %v549_v50 }
 0x114   : > { %v850_v1 = vpop.eup %849  ;;  %665 = vst.msk [vmem:[%s1296_s5] sm:$0xff] %vm664_vm1, %v848_v48  ;;  %869 = vrcp.f32 %v623_v51  ;;  %v566_v57 = vadd.f32 %v1224_v10, %v548_v55 }
 0x115   : > { %v852_v59 = vpop.eup %851  ;;  %v622_v61 = vadd.f32 1.0, %v850_v1  ;;  %871 = vpow2.f32 %v774_v16  ;;  %v777_v62 = vmul.f32 -1.442695, %v567_v56 }
 0x116   : > { %v854_v0 = vpop.eup %853  ;;  %v625_v4 = vadd.f32 1.0, %v852_v59  ;;  %v776_v30 = vmul.f32 -1.442695, %v566_v57 }
 0x117   : > { %v856_v6 = vpop.eup %855  ;;  %668 = vst.msk [vmem:[%s1296_s5 + $0x18] sm:$0xff] %vm664_vm1, %v854_v0  ;;  %873 = vrcp.f32 %v622_v61 }
 0x118   : > { %v858_v7 = vpop.eup %857  ;;  %667 = vst.msk [vmem:[%s1296_s5 + $0x10] sm:$0xff] %vm664_vm1, %v856_v6  ;;  %875 = vrcp.f32 %v625_v4 }
 0x119   : > { %v860_v15 = vpop.eup %859  ;;  %v624_v19 = vadd.f32 1.0, %v858_v7  ;;  %877 = vpow2.f32 %v777_v62 }
 0x11a   : > { %v862_v10 = vpop.eup %861  ;;  %v627_v21 = vadd.f32 1.0, %v860_v15  ;;  %879 = vpow2.f32 %v776_v30 }
 0x11b   : > { %v864_v2 = vpop.eup %863  ;;  %670 = vst.msk [vmem:[%s1296_s5 + $0x28] sm:$0xff] %vm664_vm1, %v862_v10  ;;  %881 = vrcp.f32 %v624_v19 }
 0x11c   : > { %v866_v22 = vpop.eup %865  ;;  %669 = vst.msk [vmem:[%s1296_s5 + $0x20] sm:$0xff] %vm664_vm1, %v864_v2  ;;  %883 = vrcp.f32 %v627_v21 }
 0x11d   : > { %v868_v8 = vpop.eup %867  ;;  %v626_v35 = vadd.f32 1.0, %v866_v22 }
 0x11e   : > { %v870_v25 = vpop.eup %869  ;;  %v629_v9 = vadd.f32 1.0, %v868_v8 }
 0x11f   : > { %v872_v37 = vpop.eup %871  ;;  %672 = vst.msk [vmem:[%s1296_s5 + $0x38] sm:$0xff] %vm664_vm1, %v870_v25  ;;  %885 = vrcp.f32 %v626_v35 }
 0x120   : > { %887 = vrcp.f32 %v629_v9  ;;  %v628_v20 = vadd.f32 1.0, %v872_v37 }
 0x121   : > { %v874_v26 = vpop.eup %873 }
 0x122   : > { %v876_v12 = vpop.eup %875  ;;  %671 = vst.msk [vmem:[%s1296_s5 + $0x30] sm:$0xff] %vm664_vm1, %v874_v26  ;;  %889 = vrcp.f32 %v628_v20 }
 0x123   : > { %v878_v13 = vpop.eup %877  ;;  %674 = vst.msk [vmem:[%s1296_s5 + $0x48] sm:$0xff] %vm664_vm1, %v876_v12 }
 0x124   : > { %v880_v29 = vpop.eup %879  ;;  %v631_v3 = vadd.f32 1.0, %v878_v13 }
 0x125   : > { %v882_v17 = vpop.eup %881  ;;  %v630_v18 = vadd.f32 1.0, %v880_v29 }
 0x126   : > { %v884_v54 = vpop.eup %883  ;;  %673 = vst.msk [vmem:[%s1296_s5 + $0x40] sm:$0xff] %vm664_vm1, %v882_v17  ;;  %891 = vrcp.f32 %v631_v3 }
 0x127   : > { %676 = vst.msk [vmem:[%s1296_s5 + $0x58] sm:$0xff] %vm664_vm1, %v884_v54  ;;  %893 = vrcp.f32 %v630_v18 }
 0x129   : > { %v886_v33 = vpop.eup %885 }
 0x12a   : > { %v888_v23 = vpop.eup %887  ;;  %675 = vst.msk [vmem:[%s1296_s5 + $0x50] sm:$0xff] %vm664_vm1, %v886_v33 }
 0x12b   : > { %678 = vst.msk [vmem:[%s1296_s5 + $0x68] sm:$0xff] %vm664_vm1, %v888_v23 }
 0x12c   : > { %v890_v46 = vpop.eup %889 }
 0x12d   : > { %677 = vst.msk [vmem:[%s1296_s5 + $0x60] sm:$0xff] %vm664_vm1, %v890_v46 }
 0x130   : > { %v892_v60 = vpop.eup %891 }
 0x131   : > { %v894_v11 = vpop.eup %893  ;;  %680 = vst.msk [vmem:[%s1296_s5 + $0x78] sm:$0xff] %vm664_vm1, %v892_v60 }
 0x132   : > { %679 = vst.msk [vmem:[%s1296_s5 + $0x70] sm:$0xff] %vm664_vm1, %v894_v11 }
 0x133 PF: > { %s14_s12 = sadd.s32 1, %s920_s12  }
 0x134   : > { %p11_p1 = scmp.ge.s32.totalorder %s14_s12, 6  }
 0x136   :  { %13 = sbr.rel (!%p11_p1) target bundleno = 1 (0x1), region = 67 }
 0x13d   :  { %703 = vsyncpa [#allocation3], 1 }
 0x13e   :  { %705 = vsyncpa [#allocation3 + $0x1], 1 }

</bundles_post_ra>
